<compile_context>
chip_gen: v7x
topology: tpu7x:2x2x1
jax: 0.10.0
libtpu: 0.0.40
codegen_flags: <defaults>
</compile_context>

<pallas_src>
import math

import jax
import jax.numpy as jnp
from jax.experimental import pallas as pl
from jax.experimental.pallas import tpu as pltpu

# hyper-parameters implied by the module (opt.fea_size, opt.struct, opt.latent_dim)
FEA_SIZE = 32
STRUCT = (12, 8)
LATENT_DIM = 4
NEG_SLOPE = 0.2

N_LAYERS = 6
F_PAD = 32          # every layer's in/out feature dim zero-padded to this (== FEA_SIZE)
ENC_PAD = 8         # latent rows padded to one full sublane group for an aligned store
CHUNK = 512         # inner lane strip: bounds live vregs (one (32,512) f32 act = 16 vregs)
TB_MAX = 2048       # per-grid-step lane-tile cap (amortizes per-step pipeline overhead)


def _round_up(n, m):
    return (n + m - 1) // m * m


# ---------------------------------------------------------------------------
# Kernel: whole 6-layer forward for one (TB, F_PAD) batch tile, processed in
# CHUNK-lane strips to keep the unrolled layer chain inside the vreg budget.
# ---------------------------------------------------------------------------
def generator_kernel(x_ref, w_ref, b_ref, enc_ref, dec_ref):
    tb = x_ref.shape[0]                      # static block size
    chunk = min(CHUNK, tb)                   # tb is either <= CHUNK or a multiple of it
    n_chunks = tb // chunk

    def body(c, carry):
        off = pl.multiple_of(c * chunk, 128)
        xt = x_ref[pl.ds(off, chunk), :]                         # (chunk, F_PAD)
        h = None
        for i in range(N_LAYERS):                                # statically unrolled
            rhs = xt.T if i == 0 else h                          # (F_PAD, chunk), transpose
            y = jnp.dot(w_ref[i], rhs,                           # fused into 1st matmul
                        preferred_element_type=jnp.float32) + b_ref[i]
            h = jnp.maximum(y, NEG_SLOPE * y)                    # LeakyReLU(0.2), 2 VPU ops
            if i == 2:                                           # end of encoder
                enc_ref[:, pl.ds(off, chunk)] = h[:ENC_PAD, :].astype(enc_ref.dtype)
        dec_ref[:, pl.ds(off, chunk)] = h.astype(dec_ref.dtype)  # end of decoder
        return carry

    # Real (non-unrolled) loop so the live activation strip stays at CHUNK lanes.
    jax.lax.fori_loop(0, n_chunks, body, 0)


# ---------------------------------------------------------------------------
# Parameter packing: 6 x (W (dout,din), b (dout,)) -> two zero-padded slabs.
# Called ONCE at init; the slabs are plain arguments of the jitted forward.
# ---------------------------------------------------------------------------
def pack_params(params):
    w_slab = jnp.zeros((N_LAYERS, F_PAD, F_PAD), jnp.float32)
    b_slab = jnp.zeros((N_LAYERS, F_PAD, 1), jnp.float32)
    for i, (w, b) in enumerate(params):
        dout, din = w.shape
        w_slab = w_slab.at[i, :dout, :din].set(w)
        b_slab = b_slab.at[i, :dout, 0].set(b)
    return w_slab, b_slab


# ---------------------------------------------------------------------------
# Tile policy: lane tile tb (multiple of 128; <= CHUNK or a multiple of CHUNK),
# with >= 2 balanced tiles when there is enough work (v7x megacore).
# ---------------------------------------------------------------------------
def _lane_tile(b_real):
    b128 = _round_up(b_real, 128)
    if b128 <= CHUNK:
        tb = b128
    elif b128 < 2 * CHUNK:
        tb = _round_up(b128, CHUNK)
    else:
        tb = min(TB_MAX, _round_up(-(-b128 // 2), CHUNK))   # >= 2 tiles for v7x's 2 TCs
    b_pad = _round_up(b128, tb)
    return tb, b_pad


# ---------------------------------------------------------------------------
# Wrapper: same semantics as the PyTorch module: x (B, fea) -> (encode, decode).
# ---------------------------------------------------------------------------
@jax.jit
def generator_forward(x, w_slab, b_slab):
    b_real, fea = x.shape
    assert fea == FEA_SIZE
    tb, b_pad = _lane_tile(b_real)
    num_tiles = b_pad // tb
    assert tb <= CHUNK or tb % CHUNK == 0

    # Only pad the batch axis when needed; padded columns are independent through
    # the whole network (matmul contracts over features) and are sliced off below.
    x_in = x if b_pad == b_real else jnp.pad(x, ((0, b_pad - b_real), (0, 0)))

    grid_spec = pltpu.PrefetchScalarGridSpec(
        num_scalar_prefetch=0,
        grid=(num_tiles,),
        in_specs=[
            pl.BlockSpec((tb, FEA_SIZE), lambda i: (i, 0)),               # x tile (pipelined)
            pl.BlockSpec((N_LAYERS, F_PAD, F_PAD), lambda i: (0, 0, 0)),  # weights, resident
            pl.BlockSpec((N_LAYERS, F_PAD, 1), lambda i: (0, 0, 0)),      # biases, resident
        ],
        out_specs=(
            pl.BlockSpec((ENC_PAD, tb), lambda i: (0, i)),                # lane-dense stores
            pl.BlockSpec((FEA_SIZE, tb), lambda i: (0, i)),
        ),
    )

    enc_t, dec_t = pl.pallas_call(
        generator_kernel,
        grid_spec=grid_spec,
        out_shape=(jax.ShapeDtypeStruct((ENC_PAD, b_pad), jnp.float32),
                   jax.ShapeDtypeStruct((FEA_SIZE, b_pad), jnp.float32)),
        compiler_params=pltpu.CompilerParams(dimension_semantics=("parallel",)),
    )(x_in, w_slab, b_slab)

    # Module contract is (B, latent) / (B, fea); a consumer accepting the
    # lane-dense (latent, B) / (fea, B) layout could drop these transposes.
    encode = enc_t[:LATENT_DIM, :b_real].T
    decode = dec_t[:, :b_real].T
    return encode, decode


# ---------------------------------------------------------------------------
# Deterministic init matching nn.Linear (weights in PyTorch (out, in) order).
# ---------------------------------------------------------------------------
def init_params(key):
    dims = [(STRUCT[0], FEA_SIZE), (STRUCT[1], STRUCT[0]), (LATENT_DIM, STRUCT[1]),
            (STRUCT[1], LATENT_DIM), (STRUCT[0], STRUCT[1]), (FEA_SIZE, STRUCT[0])]
    params = []
    for dout, din in dims:
        key, kw, kb = jax.random.split(key, 3)
        bound = 1.0 / math.sqrt(din)
        w = jax.random.uniform(kw, (dout, din), jnp.float32, -bound, bound)
        b = jax.random.uniform(kb, (dout,), jnp.float32, -bound, bound)
        params.append((w, b))
    return params


def reference_forward(x, params):
    h = x
    enc = None
    for i, (w, b) in enumerate(params):
        y = h @ w.T + b
        h = jnp.where(y > 0, y, NEG_SLOPE * y)
        if i == 2:
            enc = h
    return enc, h


if __name__ == "__main__":
    key = jax.random.PRNGKey(0)
    kx, kp = jax.random.split(key)
    params = init_params(kp)
    w_slab, b_slab = pack_params(params)        # packed once, outside the jitted forward

    # Small primary case (matches the original module usage) plus cases that
    # exercise batch padding, the inner chunk loop, and a multi-tile grid.
    for batch in (8, 300, 1030):
        x = jax.random.normal(jax.random.fold_in(kx, batch), (batch, FEA_SIZE),
                              jnp.float32)
        enc, dec = jax.block_until_ready(generator_forward(x, w_slab, b_slab))
        enc_ref, dec_ref = reference_forward(x, params)

        assert enc.shape == (batch, LATENT_DIM) and dec.shape == (batch, FEA_SIZE)
        assert jnp.allclose(enc, enc_ref, atol=1e-4, rtol=1e-4), f"enc mismatch @B={batch}"
        assert jnp.allclose(dec, dec_ref, atol=1e-4, rtol=1e-4), f"dec mismatch @B={batch}"

    print("KERNEL_OK")
</pallas_src>

<mosaic_0001>
module attributes {stable_mosaic.version = 11 : i64} {
  func.func @generator_kernel(%arg0: i32, %arg1: memref<128x32xf32, #tpu.memory_space<vmem>>, %arg2: memref<6x32x32xf32, #tpu.memory_space<vmem>>, %arg3: memref<6x32x1xf32, #tpu.memory_space<vmem>>, %arg4: memref<8x128xf32, #tpu.memory_space<vmem>>, %arg5: memref<32x128xf32, #tpu.memory_space<vmem>>) attributes {dimension_semantics = [#tpu.dimension_semantics<parallel>], iteration_bounds = array<i64: 1>, scalar_prefetch = 0 : i64, scratch_operands = 0 : i64, tpu.core_type = #tpu.core_type<tc>, window_params = [{transform_indices = @transform_0, window_bounds = array<i64: 128, 32>}, {pipeline_mode = #tpu.pipeline_mode<synchronous>, transform_indices = @transform_1, window_bounds = array<i64: 6, 32, 32>}, {pipeline_mode = #tpu.pipeline_mode<synchronous>, transform_indices = @transform_2, window_bounds = array<i64: 6, 32, 1>}, {transform_indices = @transform_3, window_bounds = array<i64: 8, 128>}, {transform_indices = @transform_4, window_bounds = array<i64: 32, 128>}]} {
    %c0_i32 = arith.constant 0 : i32
    %c128_i32 = arith.constant 128 : i32
    %0 = arith.muli %c0_i32, %c128_i32 : i32
    %1 = tpu.assume_multiple %0, 128 : i32
    %2 = arith.index_cast %1 : i32 to index
    %c0 = arith.constant 0 : index
    %3 = vector.load %arg1[%2, %c0] : memref<128x32xf32, #tpu.memory_space<vmem>>, vector<128x32xf32>
    %4 = tpu.transpose %3, [1, 0] : vector<128x32xf32> -> vector<32x128xf32>
    %c0_0 = arith.constant 0 : index
    %c0_1 = arith.constant 0 : index
    %c0_2 = arith.constant 0 : index
    %5 = vector.load %arg2[%c0_0, %c0_1, %c0_2] : memref<6x32x32xf32, #tpu.memory_space<vmem>>, vector<1x32x32xf32>
    %6 = vector.shape_cast %5 : vector<1x32x32xf32> to vector<32x32xf32>
    %cst = arith.constant dense<0.000000e+00> : vector<32x128xf32>
    %7 = tpu.matmul %6, %4, %cst {dimension_numbers = #tpu.dot_dimension_numbers<[1], [0], [0], [1], [0, 0, 1, 1], [], []>} : vector<32x32xf32>, vector<32x128xf32>, vector<32x128xf32> -> vector<32x128xf32>
    %c0_3 = arith.constant 0 : index
    %c0_4 = arith.constant 0 : index
    %c0_5 = arith.constant 0 : index
    %8 = vector.load %arg3[%c0_3, %c0_4, %c0_5] : memref<6x32x1xf32, #tpu.memory_space<vmem>>, vector<1x32x1xf32>
    %9 = vector.shape_cast %8 : vector<1x32x1xf32> to vector<32x1xf32>
    %10 = vector.broadcast %9 : vector<32x1xf32> to vector<32x128xf32>
    %11 = arith.addf %7, %10 : vector<32x128xf32>
    %cst_6 = arith.constant 2.000000e-01 : f32
    %12 = vector.broadcast %cst_6 : f32 to vector<32x128xf32>
    %13 = arith.mulf %12, %11 : vector<32x128xf32>
    %14 = arith.maximumf %11, %13 : vector<32x128xf32>
    %c1 = arith.constant 1 : index
    %c0_7 = arith.constant 0 : index
    %c0_8 = arith.constant 0 : index
    %15 = vector.load %arg2[%c1, %c0_7, %c0_8] : memref<6x32x32xf32, #tpu.memory_space<vmem>>, vector<1x32x32xf32>
    %16 = vector.shape_cast %15 : vector<1x32x32xf32> to vector<32x32xf32>
    %cst_9 = arith.constant dense<0.000000e+00> : vector<32x128xf32>
    %17 = tpu.matmul %16, %14, %cst_9 {dimension_numbers = #tpu.dot_dimension_numbers<[1], [0], [0], [1], [0, 0, 1, 1], [], []>} : vector<32x32xf32>, vector<32x128xf32>, vector<32x128xf32> -> vector<32x128xf32>
    %c1_10 = arith.constant 1 : index
    %c0_11 = arith.constant 0 : index
    %c0_12 = arith.constant 0 : index
    %18 = vector.load %arg3[%c1_10, %c0_11, %c0_12] : memref<6x32x1xf32, #tpu.memory_space<vmem>>, vector<1x32x1xf32>
    %19 = vector.shape_cast %18 : vector<1x32x1xf32> to vector<32x1xf32>
    %20 = vector.broadcast %19 : vector<32x1xf32> to vector<32x128xf32>
    %21 = arith.addf %17, %20 : vector<32x128xf32>
    %cst_13 = arith.constant 2.000000e-01 : f32
    %22 = vector.broadcast %cst_13 : f32 to vector<32x128xf32>
    %23 = arith.mulf %22, %21 : vector<32x128xf32>
    %24 = arith.maximumf %21, %23 : vector<32x128xf32>
    %c2 = arith.constant 2 : index
    %c0_14 = arith.constant 0 : index
    %c0_15 = arith.constant 0 : index
    %25 = vector.load %arg2[%c2, %c0_14, %c0_15] : memref<6x32x32xf32, #tpu.memory_space<vmem>>, vector<1x32x32xf32>
    %26 = vector.shape_cast %25 : vector<1x32x32xf32> to vector<32x32xf32>
    %cst_16 = arith.constant dense<0.000000e+00> : vector<32x128xf32>
    %27 = tpu.matmul %26, %24, %cst_16 {dimension_numbers = #tpu.dot_dimension_numbers<[1], [0], [0], [1], [0, 0, 1, 1], [], []>} : vector<32x32xf32>, vector<32x128xf32>, vector<32x128xf32> -> vector<32x128xf32>
    %c2_17 = arith.constant 2 : index
    %c0_18 = arith.constant 0 : index
    %c0_19 = arith.constant 0 : index
    %28 = vector.load %arg3[%c2_17, %c0_18, %c0_19] : memref<6x32x1xf32, #tpu.memory_space<vmem>>, vector<1x32x1xf32>
    %29 = vector.shape_cast %28 : vector<1x32x1xf32> to vector<32x1xf32>
    %30 = vector.broadcast %29 : vector<32x1xf32> to vector<32x128xf32>
    %31 = arith.addf %27, %30 : vector<32x128xf32>
    %cst_20 = arith.constant 2.000000e-01 : f32
    %32 = vector.broadcast %cst_20 : f32 to vector<32x128xf32>
    %33 = arith.mulf %32, %31 : vector<32x128xf32>
    %34 = arith.maximumf %31, %33 : vector<32x128xf32>
    %35 = vector.extract_strided_slice %34 {offsets = [0, 0], sizes = [8, 128], strides = [1, 1]} : vector<32x128xf32> to vector<8x128xf32>
    %c0_21 = arith.constant 0 : index
    %36 = arith.index_cast %1 : i32 to index
    %37 = vector.load %arg4[%c0_21, %36] : memref<8x128xf32, #tpu.memory_space<vmem>>, vector<8x128xf32>
    tpu.vector_store %arg4[%c0_21, %36], %35 {strides = array<i32>} : memref<8x128xf32, #tpu.memory_space<vmem>>, vector<8x128xf32>,
    %c3 = arith.constant 3 : index
    %c0_22 = arith.constant 0 : index
    %c0_23 = arith.constant 0 : index
    %38 = vector.load %arg2[%c3, %c0_22, %c0_23] : memref<6x32x32xf32, #tpu.memory_space<vmem>>, vector<1x32x32xf32>
    %39 = vector.shape_cast %38 : vector<1x32x32xf32> to vector<32x32xf32>
    %cst_24 = arith.constant dense<0.000000e+00> : vector<32x128xf32>
    %40 = tpu.matmul %39, %34, %cst_24 {dimension_numbers = #tpu.dot_dimension_numbers<[1], [0], [0], [1], [0, 0, 1, 1], [], []>} : vector<32x32xf32>, vector<32x128xf32>, vector<32x128xf32> -> vector<32x128xf32>
    %c3_25 = arith.constant 3 : index
    %c0_26 = arith.constant 0 : index
    %c0_27 = arith.constant 0 : index
    %41 = vector.load %arg3[%c3_25, %c0_26, %c0_27] : memref<6x32x1xf32, #tpu.memory_space<vmem>>, vector<1x32x1xf32>
    %42 = vector.shape_cast %41 : vector<1x32x1xf32> to vector<32x1xf32>
    %43 = vector.broadcast %42 : vector<32x1xf32> to vector<32x128xf32>
    %44 = arith.addf %40, %43 : vector<32x128xf32>
    %cst_28 = arith.constant 2.000000e-01 : f32
    %45 = vector.broadcast %cst_28 : f32 to vector<32x128xf32>
    %46 = arith.mulf %45, %44 : vector<32x128xf32>
    %47 = arith.maximumf %44, %46 : vector<32x128xf32>
    %c4 = arith.constant 4 : index
    %c0_29 = arith.constant 0 : index
    %c0_30 = arith.constant 0 : index
    %48 = vector.load %arg2[%c4, %c0_29, %c0_30] : memref<6x32x32xf32, #tpu.memory_space<vmem>>, vector<1x32x32xf32>
    %49 = vector.shape_cast %48 : vector<1x32x32xf32> to vector<32x32xf32>
    %cst_31 = arith.constant dense<0.000000e+00> : vector<32x128xf32>
    %50 = tpu.matmul %49, %47, %cst_31 {dimension_numbers = #tpu.dot_dimension_numbers<[1], [0], [0], [1], [0, 0, 1, 1], [], []>} : vector<32x32xf32>, vector<32x128xf32>, vector<32x128xf32> -> vector<32x128xf32>
    %c4_32 = arith.constant 4 : index
    %c0_33 = arith.constant 0 : index
    %c0_34 = arith.constant 0 : index
    %51 = vector.load %arg3[%c4_32, %c0_33, %c0_34] : memref<6x32x1xf32, #tpu.memory_space<vmem>>, vector<1x32x1xf32>
    %52 = vector.shape_cast %51 : vector<1x32x1xf32> to vector<32x1xf32>
    %53 = vector.broadcast %52 : vector<32x1xf32> to vector<32x128xf32>
    %54 = arith.addf %50, %53 : vector<32x128xf32>
    %cst_35 = arith.constant 2.000000e-01 : f32
    %55 = vector.broadcast %cst_35 : f32 to vector<32x128xf32>
    %56 = arith.mulf %55, %54 : vector<32x128xf32>
    %57 = arith.maximumf %54, %56 : vector<32x128xf32>
    %c5 = arith.constant 5 : index
    %c0_36 = arith.constant 0 : index
    %c0_37 = arith.constant 0 : index
    %58 = vector.load %arg2[%c5, %c0_36, %c0_37] : memref<6x32x32xf32, #tpu.memory_space<vmem>>, vector<1x32x32xf32>
    %59 = vector.shape_cast %58 : vector<1x32x32xf32> to vector<32x32xf32>
    %cst_38 = arith.constant dense<0.000000e+00> : vector<32x128xf32>
    %60 = tpu.matmul %59, %57, %cst_38 {dimension_numbers = #tpu.dot_dimension_numbers<[1], [0], [0], [1], [0, 0, 1, 1], [], []>} : vector<32x32xf32>, vector<32x128xf32>, vector<32x128xf32> -> vector<32x128xf32>
    %c5_39 = arith.constant 5 : index
    %c0_40 = arith.constant 0 : index
    %c0_41 = arith.constant 0 : index
    %61 = vector.load %arg3[%c5_39, %c0_40, %c0_41] : memref<6x32x1xf32, #tpu.memory_space<vmem>>, vector<1x32x1xf32>
    %62 = vector.shape_cast %61 : vector<1x32x1xf32> to vector<32x1xf32>
    %63 = vector.broadcast %62 : vector<32x1xf32> to vector<32x128xf32>
    %64 = arith.addf %60, %63 : vector<32x128xf32>
    %cst_42 = arith.constant 2.000000e-01 : f32
    %65 = vector.broadcast %cst_42 : f32 to vector<32x128xf32>
    %66 = arith.mulf %65, %64 : vector<32x128xf32>
    %67 = arith.maximumf %64, %66 : vector<32x128xf32>
    %c0_43 = arith.constant 0 : index
    %68 = arith.index_cast %1 : i32 to index
    %69 = vector.load %arg5[%c0_43, %68] : memref<32x128xf32, #tpu.memory_space<vmem>>, vector<32x128xf32>
    tpu.vector_store %arg5[%c0_43, %68], %67 {strides = array<i32>} : memref<32x128xf32, #tpu.memory_space<vmem>>, vector<32x128xf32>,
    %c1_i32 = arith.constant 1 : i32
    return
  }
  func.func @transform_0(%arg0: i32) -> (i32, i32) {
    %c0_i32 = arith.constant 0 : i32
    %c0_i32_0 = arith.constant 0 : i32
    return %arg0, %c0_i32 : i32, i32
  }
  func.func @transform_1(%arg0: i32) -> (i32, i32, i32) {
    %c0_i32 = arith.constant 0 : i32
    %c0_i32_0 = arith.constant 0 : i32
    %c0_i32_1 = arith.constant 0 : i32
    %c0_i32_2 = arith.constant 0 : i32
    return %c0_i32, %c0_i32_0, %c0_i32_1 : i32, i32, i32
  }
  func.func @transform_2(%arg0: i32) -> (i32, i32, i32) {
    %c0_i32 = arith.constant 0 : i32
    %c0_i32_0 = arith.constant 0 : i32
    %c0_i32_1 = arith.constant 0 : i32
    %c0_i32_2 = arith.constant 0 : i32
    return %c0_i32, %c0_i32_0, %c0_i32_1 : i32, i32, i32
  }
  func.func @transform_3(%arg0: i32) -> (i32, i32) {
    %c0_i32 = arith.constant 0 : i32
    %c0_i32_0 = arith.constant 0 : i32
    return %c0_i32, %arg0 : i32, i32
  }
  func.func @transform_4(%arg0: i32) -> (i32, i32) {
    %c0_i32 = arith.constant 0 : i32
    %c0_i32_0 = arith.constant 0 : i32
    return %c0_i32, %arg0 : i32, i32
  }
}

</mosaic_0001>

<bundles_post_ra>
// kernel: generator_forward.1
= control target key start
LH: loop header
LB: loop body
LE: loop exit
PB: predicated region body
PF: predicated region fallthrough
CT: control target
= control target key end

     0   :  { %vm60_vm0 = vcmask 261120   ;;  %v1241_v3 = vmov 0   ;;  %s1536_s0 = inlined_call_operand.vmem [shape: f32[128,32], index: 0, kind: input, shape index: {}]   ;;  %s1537_s1 = inlined_call_operand.vmem [shape: f32[6,32,32], index: 1, kind: input, shape index: {}]   ;;  %s1538_s2 = inlined_call_operand.vmem [shape: f32[6,32,1], index: 2, kind: input, shape index: {}]   ;;  %s1539_s3 = inlined_call_operand.vmem [shape: f32[8,128], index: 3, kind: output, shape index: {0}]   ;;  %s1540_s4 = inlined_call_operand.vmem [shape: f32[32,128], index: 4, kind: output, shape index: {1}]  }
   0x1   :  { %v16_v0 = vld [vmem:[%s1536_s0] sm:$0xff]  ;;  %v17_v1 = vld [vmem:[%s1536_s0 + $0x8] sm:$0xff]  ;;  %vm1275_vm1 = vmpackc.low %vm60_vm0, %vm60_vm0  ;;  %1239 = vset.pattern.permute.xlu0 %v1241_v3  ;;  %1240 = vset.pattern.permute.xlu1 %v1241_v3 }
   0x2   :  { %v1150_v4 = vpack.c.bf16 %v17_v1, %v16_v0  ;;  %v18_v5 = vld [vmem:[%s1536_s0 + $0x10] sm:$0xff]  ;;  %v19_v6 = vld [vmem:[%s1536_s0 + $0x18] sm:$0xff]  ;;  %v32_v8 = vld [vmem:[%s1537_s1] sm:$0xff] }
   0x3   :  { %v1156_v7 = vpack.c.bf16 %v19_v6, %v18_v5  ;;  %v20_v9 = vld [vmem:[%s1536_s0 + $0x20] sm:$0xff]  ;;  %v21_v10 = vld [vmem:[%s1536_s0 + $0x28] sm:$0xff]  ;;  %1074 = vmatprep.mubr.msk.f32.mxu0 %vm60_vm0, %v32_v8  ;;  %v38_v12 = vld [vmem:[%s1538_s2 + $0x10] sm:$0xff] }
   0x4   :  { %1152 = vmatprep.subr.msk.bf16.mxu0 %vm1275_vm1, %v1150_v4  ;;  %v36_v11 = vld [vmem:[%s1538_s2] sm:$0xff]  ;;  %52 = vperm.xlu1 %1240, %v38_v12   ;;  %v1162_v13 = vpack.c.bf16 %v21_v10, %v20_v9  ;;  %v37_v14 = vld [vmem:[%s1538_s2 + $0x8] sm:$0xff]  ;;  %v39_v15 = vld [vmem:[%s1538_s2 + $0x18] sm:$0xff] }
   0x5   :  { %1155 = vmatpush3.bf16.xpose.msk.msra.mxu0 %vm1275_vm1, %v1150_v4  ;;  %42 = vperm.xlu0 %1239, %v36_v11   ;;  %v926_v16 = vld [vmem:[%s1538_s2 + $0x20] sm:$0xff]  ;;  %v22_v17 = vld [vmem:[%s1536_s0 + $0x30] sm:$0xff]  ;;  %v23_v18 = vld [vmem:[%s1536_s0 + $0x38] sm:$0xff] }
   0x6   :  { %1158 = vmatprep.subr.msk.bf16.mxu0 %vm1275_vm1, %v1156_v7  ;;  %v927_v19 = vld [vmem:[%s1538_s2 + $0x28] sm:$0xff]  ;;  %v1168_v20 = vpack.c.bf16 %v23_v18, %v22_v17  ;;  %v928_v21 = vld [vmem:[%s1538_s2 + $0x30] sm:$0xff]  ;;  %v929_v22 = vld [vmem:[%s1538_s2 + $0x38] sm:$0xff] }
   0x7   :  { %v938_v23 = vld [vmem:[%s1538_s2 + $0x40] sm:$0xff]  ;;  %v25_v25 = vld [vmem:[%s1536_s0 + $0x48] sm:$0xff]  ;;  %v940_v28 = vld [vmem:[%s1538_s2 + $0x50] sm:$0xff] }
   0x8   :  { %57 = vperm.xlu1 %1240, %v39_v15   ;;  %v24_v24 = vld [vmem:[%s1536_s0 + $0x40] sm:$0xff]  ;;  %v939_v26 = vld [vmem:[%s1538_s2 + $0x48] sm:$0xff]  ;;  %v941_v29 = vld [vmem:[%s1538_s2 + $0x58] sm:$0xff] }
   0x9   :  { %47 = vperm.xlu0 %1239, %v37_v14   ;;  %v1174_v27 = vpack.c.bf16 %v25_v25, %v24_v24  ;;  %v950_v30 = vld [vmem:[%s1538_s2 + $0x60] sm:$0xff]  ;;  %v26_v31 = vld [vmem:[%s1536_s0 + $0x50] sm:$0xff]  ;;  %v27_v32 = vld [vmem:[%s1536_s0 + $0x58] sm:$0xff] }
   0xa   :  { %v951_v33 = vld [vmem:[%s1538_s2 + $0x68] sm:$0xff]  ;;  %v1180_v34 = vpack.c.bf16 %v27_v32, %v26_v31  ;;  %v952_v35 = vld [vmem:[%s1538_s2 + $0x70] sm:$0xff]  ;;  %v953_v36 = vld [vmem:[%s1538_s2 + $0x78] sm:$0xff] }
   0xb   :  { %v962_v37 = vld [vmem:[%s1538_s2 + $0x80] sm:$0xff]  ;;  %v29_v39 = vld [vmem:[%s1536_s0 + $0x68] sm:$0xff]  ;;  %v964_v42 = vld [vmem:[%s1538_s2 + $0x90] sm:$0xff] }
   0xc   :  { %231 = vperm.xlu1 %1240, %v927_v19   ;;  %v28_v38 = vld [vmem:[%s1536_s0 + $0x60] sm:$0xff]  ;;  %v963_v40 = vld [vmem:[%s1538_s2 + $0x88] sm:$0xff]  ;;  %v965_v43 = vld [vmem:[%s1538_s2 + $0x98] sm:$0xff] }
   0xd   :  { %1161 = vmatpush3.bf16.xpose.msk.msra.mxu0 %vm1275_vm1, %v1156_v7  ;;  %226 = vperm.xlu0 %1239, %v926_v16   ;;  %v1186_v41 = vpack.c.bf16 %v29_v39, %v28_v38  ;;  %v974_v44 = vld [vmem:[%s1538_s2 + $0xa0] sm:$0xff]  ;;  %v30_v45 = vld [vmem:[%s1536_s0 + $0x70] sm:$0xff]  ;;  %v31_v46 = vld [vmem:[%s1536_s0 + $0x78] sm:$0xff] }
   0xe   :  { %1164 = vmatprep.subr.msk.bf16.mxu0 %vm1275_vm1, %v1162_v13  ;;  %v975_v47 = vld [vmem:[%s1538_s2 + $0xa8] sm:$0xff]  ;;  %v1192_v48 = vpack.c.bf16 %v31_v46, %v30_v45  ;;  %v976_v49 = vld [vmem:[%s1538_s2 + $0xb0] sm:$0xff]  ;;  %v977_v50 = vld [vmem:[%s1538_s2 + $0xb8] sm:$0xff] }
   0xf   :  { %v33_v51 = vld [vmem:[%s1537_s1 + $0x8] sm:$0xff]  ;;  %v34_v52 = vld [vmem:[%s1537_s1 + $0x10] sm:$0xff]  ;;  %v35_v53 = vld [vmem:[%s1537_s1 + $0x18] sm:$0xff] }
  0x10   :  { %241 = vperm.xlu1 %1240, %v929_v22   ;;  %v922_v54 = vld [vmem:[%s1537_s1 + $0x20] sm:$0xff]  ;;  %v924_v14 = vld [vmem:[%s1537_s1 + $0x30] sm:$0xff]  ;;  %v925_v15 = vld [vmem:[%s1537_s1 + $0x38] sm:$0xff] }
  0x11   :  { %236 = vperm.xlu0 %1239, %v928_v21   ;;  %1088 = vmatprep.mubr.msk.f32.mxu1 %vm60_vm0, %v922_v54  ;;  %v934_v16 = vld [vmem:[%s1537_s1 + $0x40] sm:$0xff]  ;;  %v935_v39 = vld [vmem:[%s1537_s1 + $0x48] sm:$0xff] }
  0x14   :  { %366 = vperm.xlu1 %1240, %v939_v26  }
  0x15   :  { %1167 = vmatpush3.bf16.xpose.msk.msra.mxu0 %vm1275_vm1, %v1162_v13  ;;  %361 = vperm.xlu0 %1239, %v938_v23   ;;  %v923_v13 = vld [vmem:[%s1537_s1 + $0x28] sm:$0xff] }
  0x16   :  { %1170 = vmatprep.subr.msk.bf16.mxu0 %vm1275_vm1, %v1168_v20 }
  0x18   :  { %376 = vperm.xlu1 %1240, %v941_v29  }
  0x19   :  { %371 = vperm.xlu0 %1239, %v940_v28  }
  0x1c   :  { %502 = vperm.xlu1 %1240, %v951_v33  }
  0x1d   :  { %1173 = vmatpush3.bf16.xpose.msk.msra.mxu0 %vm1275_vm1, %v1168_v20  ;;  %497 = vperm.xlu0 %1239, %v950_v30  }
  0x1e   :  { %1176 = vmatprep.subr.msk.bf16.mxu0 %vm1275_vm1, %v1174_v27 }
  0x20   :  { %512 = vperm.xlu1 %1240, %v953_v36  }
  0x21   :  { %507 = vperm.xlu0 %1239, %v952_v35  }
  0x24   :  { %637 = vperm.xlu1 %1240, %v963_v40   ;;  %v936_v40 = vld [vmem:[%s1537_s1 + $0x50] sm:$0xff] }
  0x25   :  { %1179 = vmatpush3.bf16.xpose.msk.msra.mxu0 %vm1275_vm1, %v1174_v27  ;;  %632 = vperm.xlu0 %1239, %v962_v37  }
  0x26   :  { %1182 = vmatprep.subr.msk.bf16.mxu0 %vm1275_vm1, %v1180_v34 }
  0x28   :  { %647 = vperm.xlu1 %1240, %v965_v43  }
  0x29   :  { %642 = vperm.xlu0 %1239, %v964_v42   ;;  %v946_v42 = vld [vmem:[%s1537_s1 + $0x60] sm:$0xff] }
  0x2c   :  { %772 = vperm.xlu1 %1240, %v975_v47  }
  0x2d   :  { %1185 = vmatpush3.bf16.xpose.msk.msra.mxu0 %vm1275_vm1, %v1180_v34  ;;  %767 = vperm.xlu0 %1239, %v974_v44  }
  0x2e   :  { %1188 = vmatprep.subr.msk.bf16.mxu0 %vm1275_vm1, %v1186_v41 }
  0x30   :  { %782 = vperm.xlu1 %1240, %v977_v50  }
  0x31   :  { %777 = vperm.xlu0 %1239, %v976_v49  }
  0x35   :  { %1191 = vmatpush3.bf16.xpose.msk.msra.mxu0 %vm1275_vm1, %v1186_v41  ;;  %v937_v41 = vld [vmem:[%s1537_s1 + $0x58] sm:$0xff] }
  0x36   :  { %1194 = vmatprep.subr.msk.bf16.mxu0 %vm1275_vm1, %v1192_v48 }
  0x3d   :  { %1197 = vmatpush3.bf16.xpose.msk.msra.mxu0 %vm1275_vm1, %v1192_v48 }
  0x44   :  { %1075 = vmatmul.mubr.msk.f32.vlgmr.msra.gmra.mrb[0].mxu0 %vm60_vm0, %v33_v51 }
  0x45   :  { %1077 = vmatprep.mubr.msk.f32.mxu0 %vm60_vm0, %v34_v52 }
  0x48   :  { %1078 = vmatmul.mubr.msk.f32.gmra.mrb[2].mxu0 %vm60_vm0, %v35_v53 }
  0x83   :  { %v53_v56 = vpop.permute.xlu1 %52 }
  0x84   :  { %v43_v55 = vpop.permute.xlu0 %42 }
  0x87   :  { %v58_v63 = vpop.permute.xlu1 %57 }
  0x88   :  { %v48_v57 = vpop.permute.xlu0 %47 }
  0x8b   :  { %v232_v17 = vpop.permute.xlu1 %231 }
  0x8c   :  { %v227_v18 = vpop.permute.xlu0 %226 }
  0x8f   :  { %v242_v24 = vpop.permute.xlu1 %241 }
  0x90   :  { %v237_v27 = vpop.permute.xlu0 %236 }
  0x93   :  { %v367_v43 = vpop.permute.xlu1 %366 }
  0x94   :  { %v362_v44 = vpop.permute.xlu0 %361 }
  0x97   :  { %v377_v50 = vpop.permute.xlu1 %376 }
  0x98   :  { %v372_v53 = vpop.permute.xlu0 %371 }
 0x117   :  { %v1076_v58 = vpop.f32.mrb[0].mxu0 }
 0x118   :  { %v193_v59 = vadd.f32 %v1076_v58, %v48_v57  ;;  %v187_v60 = vpop.f32.mrb[1].mxu0 }
 0x119   :  { %v188_v61 = vadd.f32 %v187_v60, %v43_v55 }
 0x11a   :  { %v207_v62 = vmul.f32 0.2, %v193_v59 }
 0x11b   :  { %v206_v0 = vmul.f32 0.2, %v188_v61  ;;  %v1079_v1 = vpop.f32.mrb[2].mxu0 }
 0x11c   :  { %v211_v2 = vmax.f32 %v193_v59, %v207_v62  ;;  %v203_v3 = vadd.f32 %v1079_v1, %v58_v63  ;;  %v197_v4 = vpop.f32.mrb[3].mxu0  ;;  %v947_v1 = vld [vmem:[%s1537_s1 + $0x68] sm:$0xff] }
 0x11d   :  { %v210_v5 = vmax.f32 %v188_v61, %v206_v0  ;;  %v198_v6 = vadd.f32 %v197_v4, %v53_v56  ;;  %v958_v4 = vld [vmem:[%s1537_s1 + $0x80] sm:$0xff] }
 0x11e   :  { %v209_v7 = vmul.f32 0.2, %v203_v3 }
 0x11f   :  { %v208_v8 = vmul.f32 0.2, %v198_v6  ;;  %v1198_v9 = vpack.c.bf16 %v211_v2, %v210_v5  ;;  %v948_v2 = vld [vmem:[%s1537_s1 + $0x70] sm:$0xff]  ;;  %v503_v5 = vpop.permute.xlu1 %502 }
 0x120   :  { %v213_v10 = vmax.f32 %v203_v3, %v209_v7  ;;  %v949_v3 = vld [vmem:[%s1537_s1 + $0x78] sm:$0xff] }
 0x121   :  { %v212_v11 = vmax.f32 %v198_v6, %v208_v8  ;;  %1199 = vmatprep.subr.bf16.mxu1 %v1198_v9  ;;  %v498_v6 = vpop.permute.xlu0 %497 }
 0x122   :  { %1201 = vmatpush3.bf16.msra.mxu1 %v1198_v9 }
 0x123   :  { %v1202_v12 = vpack.c.bf16 %v213_v10, %v212_v11 }
 0x125   :  { %1203 = vmatprep.subr.bf16.mxu1 %v1202_v12 }
 0x126   :  { %1205 = vmatpush3.bf16.msra.mxu1 %v1202_v12  ;;  %v513_v12 = vpop.permute.xlu1 %512 }
 0x129   :  { %1089 = vmatmul.mubr.msk.f32.vlgmr.msra.gmra.mrb[0].mxu1 %vm60_vm0, %v923_v13 }
 0x12a   :  { %1091 = vmatprep.mubr.msk.f32.mxu1 %vm60_vm0, %v924_v14 }
 0x12d   :  { %1092 = vmatmul.mubr.msk.f32.gmra.mrb[2].mxu1 %vm60_vm0, %v925_v15  ;;  %v508_v15 = vpop.permute.xlu0 %507 }
 0x12e   :  { %1102 = vmatprep.mubr.msk.f32.mxu1 %vm60_vm0, %v934_v16 }
 0x1fc   :  { %v1090_v19 = vpop.f32.mrb[0].mxu1 }
 0x1fd   :  { %v328_v20 = vadd.f32 %v1090_v19, %v232_v17  ;;  %v322_v21 = vpop.f32.mrb[1].mxu1 }
 0x1fe   :  { %v323_v22 = vadd.f32 %v322_v21, %v227_v18 }
 0x1ff   :  { %v342_v23 = vmul.f32 0.2, %v328_v20 }
 0x200   :  { %v341_v25 = vmul.f32 0.2, %v323_v22  ;;  %v1093_v26 = vpop.f32.mrb[2].mxu1 }
 0x201   :  { %v346_v28 = vmax.f32 %v328_v20, %v342_v23  ;;  %v338_v29 = vadd.f32 %v1093_v26, %v242_v24  ;;  %v332_v30 = vpop.f32.mrb[3].mxu1 }
 0x202   :  { %v345_v31 = vmax.f32 %v323_v22, %v341_v25  ;;  %v333_v32 = vadd.f32 %v332_v30, %v237_v27  ;;  %v959_v27 = vld [vmem:[%s1537_s1 + $0x88] sm:$0xff]  ;;  %v970_v30 = vld [vmem:[%s1537_s1 + $0xa0] sm:$0xff] }
 0x203   :  { %v344_v33 = vmul.f32 0.2, %v338_v29 }
 0x204   :  { %v343_v34 = vmul.f32 0.2, %v333_v32  ;;  %v1206_v35 = vpack.c.bf16 %v346_v28, %v345_v31  ;;  %v960_v28 = vld [vmem:[%s1537_s1 + $0x90] sm:$0xff]  ;;  %v638_v31 = vpop.permute.xlu1 %637 }
 0x205   :  { %v348_v36 = vmax.f32 %v338_v29, %v344_v33  ;;  %v961_v29 = vld [vmem:[%s1537_s1 + $0x98] sm:$0xff] }
 0x206   :  { %v347_v37 = vmax.f32 %v333_v32, %v343_v34  ;;  %1207 = vmatprep.subr.bf16.mxu1 %v1206_v35  ;;  %v633_v32 = vpop.permute.xlu0 %632 }
 0x207   :  { %1209 = vmatpush3.bf16.msra.mxu1 %v1206_v35 }
 0x208   :  { %v1210_v38 = vpack.c.bf16 %v348_v36, %v347_v37 }
 0x20a   :  { %1211 = vmatprep.subr.bf16.mxu1 %v1210_v38 }
 0x20b   :  { %1213 = vmatpush3.bf16.msra.mxu1 %v1210_v38  ;;  %v648_v38 = vpop.permute.xlu1 %647 }
 0x20e   :  { %1103 = vmatmul.mubr.msk.f32.vlgmr.msra.gmra.mrb[4].mxu1 %vm60_vm0, %v935_v39 }
 0x20f   :  { %1105 = vmatprep.mubr.msk.f32.mxu1 %vm60_vm0, %v936_v40 }
 0x212   :  { %1106 = vmatmul.mubr.msk.f32.gmra.mrb[6].mxu1 %vm60_vm0, %v937_v41  ;;  %v643_v41 = vpop.permute.xlu0 %642 }
 0x213   :  { %1116 = vmatprep.mubr.msk.f32.mxu1 %vm60_vm0, %v946_v42 }
 0x2e1   :  { %v1104_v45 = vpop.f32.mrb[4].mxu1 }
 0x2e2   :  { %v463_v46 = vadd.f32 %v1104_v45, %v367_v43  ;;  %v457_v47 = vpop.f32.mrb[5].mxu1 }
 0x2e3   :  { %v458_v48 = vadd.f32 %v457_v47, %v362_v44 }
 0x2e4   :  { %v477_v49 = vmul.f32 0.2, %v463_v46 }
 0x2e5   :  { %v476_v51 = vmul.f32 0.2, %v458_v48  ;;  %v1107_v52 = vpop.f32.mrb[6].mxu1 }
 0x2e6   :  { %v481_v54 = vmax.f32 %v463_v46, %v477_v49  ;;  %v473_v55 = vadd.f32 %v1107_v52, %v377_v50  ;;  %v467_v56 = vpop.f32.mrb[7].mxu1 }
 0x2e7   :  { %v480_v57 = vmax.f32 %v458_v48, %v476_v51  ;;  %v468_v58 = vadd.f32 %v467_v56, %v372_v53  ;;  %v971_v53 = vld [vmem:[%s1537_s1 + $0xa8] sm:$0xff]  ;;  %v773_v56 = vpop.permute.xlu1 %772 }
 0x2e8   :  { %v479_v59 = vmul.f32 0.2, %v473_v55 }
 0x2e9   :  { %484 = vst [vmem:[%s1539_s3] sm:$0xff] %v480_v57  ;;  %v478_v60 = vmul.f32 0.2, %v468_v58  ;;  %v1214_v61 = vpack.c.bf16 %v481_v54, %v480_v57  ;;  %v972_v54 = vld [vmem:[%s1537_s1 + $0xb0] sm:$0xff]  ;;  %v768_v57 = vpop.permute.xlu0 %767 }
 0x2ea   :  { %v483_v62 = vmax.f32 %v473_v55, %v479_v59  ;;  %v973_v55 = vld [vmem:[%s1537_s1 + $0xb8] sm:$0xff] }
 0x2eb   :  { %v482_v63 = vmax.f32 %v468_v58, %v478_v60  ;;  %1215 = vmatprep.subr.bf16.mxu1 %v1214_v61 }
 0x2ec   :  { %1217 = vmatpush3.bf16.msra.mxu1 %v1214_v61 }
 0x2ed   :  { %v1218_v0 = vpack.c.bf16 %v483_v62, %v482_v63  ;;  %v783_v63 = vpop.permute.xlu1 %782 }
 0x2ef   :  { %1219 = vmatprep.subr.bf16.mxu1 %v1218_v0 }
 0x2f0   :  { %1221 = vmatpush3.bf16.msra.mxu1 %v1218_v0 }
 0x2f3   :  { %1117 = vmatmul.mubr.msk.f32.vlgmr.msra.gmra.mrb[8].mxu1 %vm60_vm0, %v947_v1 }
 0x2f4   :  { %1119 = vmatprep.mubr.msk.f32.mxu1 %vm60_vm0, %v948_v2  ;;  %v778_v2 = vpop.permute.xlu0 %777 }
 0x2f7   :  { %1120 = vmatmul.mubr.msk.f32.gmra.mrb[10].mxu1 %vm60_vm0, %v949_v3 }
 0x2f8   :  { %1130 = vmatprep.mubr.msk.f32.mxu1 %vm60_vm0, %v958_v4 }
 0x3c6   :  { %v1118_v7 = vpop.f32.mrb[8].mxu1 }
 0x3c7   :  { %v599_v8 = vadd.f32 %v1118_v7, %v503_v5  ;;  %v593_v9 = vpop.f32.mrb[9].mxu1 }
 0x3c8   :  { %v594_v10 = vadd.f32 %v593_v9, %v498_v6 }
 0x3c9   :  { %v613_v11 = vmul.f32 0.2, %v599_v8 }
 0x3ca   :  { %v612_v13 = vmul.f32 0.2, %v594_v10  ;;  %v1121_v14 = vpop.f32.mrb[10].mxu1 }
 0x3cb   :  { %v617_v16 = vmax.f32 %v599_v8, %v613_v11  ;;  %v609_v17 = vadd.f32 %v1121_v14, %v513_v12  ;;  %v603_v18 = vpop.f32.mrb[11].mxu1 }
 0x3cc   :  { %v616_v19 = vmax.f32 %v594_v10, %v612_v13  ;;  %v604_v20 = vadd.f32 %v603_v18, %v508_v15 }
 0x3cd   :  { %v615_v21 = vmul.f32 0.2, %v609_v17 }
 0x3ce   :  { %v614_v22 = vmul.f32 0.2, %v604_v20  ;;  %v1222_v23 = vpack.c.bf16 %v617_v16, %v616_v19 }
 0x3cf   :  { %v619_v24 = vmax.f32 %v609_v17, %v615_v21 }
 0x3d0   :  { %v618_v25 = vmax.f32 %v604_v20, %v614_v22  ;;  %1223 = vmatprep.subr.bf16.mxu1 %v1222_v23 }
 0x3d1   :  { %1225 = vmatpush3.bf16.msra.mxu1 %v1222_v23 }
 0x3d2   :  { %v1226_v26 = vpack.c.bf16 %v619_v24, %v618_v25 }
 0x3d4   :  { %1227 = vmatprep.subr.bf16.mxu1 %v1226_v26 }
 0x3d5   :  { %1229 = vmatpush3.bf16.msra.mxu1 %v1226_v26 }
 0x3d8   :  { %1131 = vmatmul.mubr.msk.f32.vlgmr.msra.gmra.mrb[12].mxu1 %vm60_vm0, %v959_v27 }
 0x3d9   :  { %1133 = vmatprep.mubr.msk.f32.mxu1 %vm60_vm0, %v960_v28 }
 0x3dc   :  { %1134 = vmatmul.mubr.msk.f32.gmra.mrb[14].mxu1 %vm60_vm0, %v961_v29 }
 0x3dd   :  { %1144 = vmatprep.mubr.msk.f32.mxu1 %vm60_vm0, %v970_v30 }
 0x4ab   :  { %v1132_v33 = vpop.f32.mrb[12].mxu1 }
 0x4ac   :  { %v734_v34 = vadd.f32 %v1132_v33, %v638_v31  ;;  %v728_v35 = vpop.f32.mrb[13].mxu1 }
 0x4ad   :  { %v729_v36 = vadd.f32 %v728_v35, %v633_v32 }
 0x4ae   :  { %v748_v37 = vmul.f32 0.2, %v734_v34 }
 0x4af   :  { %v747_v39 = vmul.f32 0.2, %v729_v36  ;;  %v1135_v40 = vpop.f32.mrb[14].mxu1 }
 0x4b0   :  { %v752_v42 = vmax.f32 %v734_v34, %v748_v37  ;;  %v744_v43 = vadd.f32 %v1135_v40, %v648_v38  ;;  %v738_v44 = vpop.f32.mrb[15].mxu1 }
 0x4b1   :  { %v751_v45 = vmax.f32 %v729_v36, %v747_v39  ;;  %v739_v46 = vadd.f32 %v738_v44, %v643_v41 }
 0x4b2   :  { %v750_v47 = vmul.f32 0.2, %v744_v43 }
 0x4b3   :  { %v749_v48 = vmul.f32 0.2, %v739_v46  ;;  %v1230_v49 = vpack.c.bf16 %v752_v42, %v751_v45 }
 0x4b4   :  { %v754_v50 = vmax.f32 %v744_v43, %v750_v47 }
 0x4b5   :  { %v753_v51 = vmax.f32 %v739_v46, %v749_v48  ;;  %1231 = vmatprep.subr.bf16.mxu1 %v1230_v49 }
 0x4b6   :  { %1233 = vmatpush3.bf16.msra.mxu1 %v1230_v49 }
 0x4b7   :  { %v1234_v52 = vpack.c.bf16 %v754_v50, %v753_v51 }
 0x4b9   :  { %1235 = vmatprep.subr.bf16.mxu1 %v1234_v52 }
 0x4ba   :  { %1237 = vmatpush3.bf16.msra.mxu1 %v1234_v52 }
 0x4bd   :  { %1145 = vmatmul.mubr.msk.f32.vlgmr.msra.gmra.mrb[16].mxu1 %vm60_vm0, %v971_v53 }
 0x4be   :  { %1147 = vmatprep.mubr.msk.f32.mxu1 %vm60_vm0, %v972_v54 }
 0x4c1   :  { %1148 = vmatmul.mubr.msk.f32.gmra.mrb[18].mxu1 %vm60_vm0, %v973_v55 }
 0x590   :  { %v1146_v58 = vpop.f32.mrb[16].mxu1 }
 0x591   :  { %v869_v59 = vadd.f32 %v1146_v58, %v773_v56  ;;  %v863_v60 = vpop.f32.mrb[17].mxu1 }
 0x592   :  { %v864_v61 = vadd.f32 %v863_v60, %v768_v57 }
 0x593   :  { %v883_v62 = vmul.f32 0.2, %v869_v59 }
 0x594   :  { %v882_v0 = vmul.f32 0.2, %v864_v61  ;;  %v1149_v1 = vpop.f32.mrb[18].mxu1 }
 0x595   :  { %v887_v3 = vmax.f32 %v869_v59, %v883_v62  ;;  %v879_v4 = vadd.f32 %v1149_v1, %v783_v63  ;;  %v873_v5 = vpop.f32.mrb[19].mxu1 }
 0x596   :  { %v886_v6 = vmax.f32 %v864_v61, %v882_v0  ;;  %v874_v7 = vadd.f32 %v873_v5, %v778_v2 }
 0x597   :  { %891 = vst [vmem:[%s1540_s4 + $0x8] sm:$0xff] %v887_v3  ;;  %v885_v8 = vmul.f32 0.2, %v879_v4 }
 0x598   :  { %890 = vst [vmem:[%s1540_s4] sm:$0xff] %v886_v6  ;;  %v884_v9 = vmul.f32 0.2, %v874_v7 }
 0x599   :  { %v889_v10 = vmax.f32 %v879_v4, %v885_v8 }
 0x59a   :  { %v888_v11 = vmax.f32 %v874_v7, %v884_v9 }
 0x59b   :  { %893 = vst [vmem:[%s1540_s4 + $0x18] sm:$0xff] %v889_v10 }
 0x59c   :  { %892 = vst [vmem:[%s1540_s4 + $0x10] sm:$0xff] %v888_v11 }

</bundles_post_ra>
